<compile_context>
chip_gen: v6e
topology: v6e:2x2x1
jax: 0.10.0
libtpu: 0.0.40
codegen_flags: <defaults>
</compile_context>

<pallas_src>
import functools

import jax
import jax.numpy as jnp
from jax.experimental import pallas as pl
from jax.experimental.pallas import tpu as pltpu

IN_F, HID_F, OUT_F = 10, 5, 2

# Packed-parameter layout (row-major flattens, f32):
#   [0, 50)   : W1  (IN_F x HID_F), entry W1[i, j] at i*HID_F + j
#   [50, 55)  : b1  (HID_F,)
#   [55, 65)  : W2  (HID_F x OUT_F), entry W2[j, k] at 55 + j*OUT_F + k
#   [65, 67)  : b2  (OUT_F,)
_W1_OFF = 0
_B1_OFF = IN_F * HID_F
_W2_OFF = _B1_OFF + HID_F
_B2_OFF = _W2_OFF + HID_F * OUT_F
N_PARAMS = _B2_OFF + OUT_F  # 67


def mlp_kernel(p_ref, xt_ref, ot_ref):
    """p_ref: SMEM f32[67]; xt_ref: VMEM (10, TB); ot_ref: VMEM (2, TB)."""
    # Load the activation tile row-by-row (each row is a lane-dense (1, TB)).
    x_rows = [xt_ref[i:i + 1, :] for i in range(IN_F)]

    # Layer 1 + ReLU: h[j] = relu(sum_i W1[i,j] * x[i] + b1[j])
    # 50 scalar-broadcast FMAs per tile column -> pure VPU work, no MXU/XLU.
    h_rows = []
    for j in range(HID_F):
        acc = x_rows[0] * p_ref[_W1_OFF + j]
        for i in range(1, IN_F):
            acc = acc + x_rows[i] * p_ref[_W1_OFF + i * HID_F + j]
        acc = acc + p_ref[_B1_OFF + j]
        h_rows.append(jnp.maximum(acc, 0.0))

    # Layer 2: y[k] = sum_j W2[j,k] * h[j] + b2[k]  (10 FMAs)
    for k in range(OUT_F):
        acc = h_rows[0] * p_ref[_W2_OFF + k]
        for j in range(1, HID_F):
            acc = acc + h_rows[j] * p_ref[_W2_OFF + j * OUT_F + k]
        acc = acc + p_ref[_B2_OFF + k]
        ot_ref[k:k + 1, :] = acc  # lane-dense (1, TB) store


def _round_up(v, m):
    return ((v + m - 1) // m) * m


def pack_params(w1, b1, w2, b2):
    """Pack {w1 (10,5), b1 (5,), w2 (5,2), b2 (2,)} into one f32[67] buffer.

    Weights are stored [in_features, out_features], i.e. PyTorch weight.T,
    so the kernel computes x @ W + b == x @ weight.T + bias.
    Do this ONCE on the host, not per forward call.
    """
    packed = jnp.concatenate([
        w1.reshape(-1), b1.reshape(-1), w2.reshape(-1), b2.reshape(-1)
    ]).astype(jnp.float32)
    assert packed.shape == (N_PARAMS,)
    return packed


@functools.partial(jax.jit, static_argnames=("block_b",))
def simple_net_forward(x, packed_params, *, block_b=512):
    """x: (B, 10) f32; packed_params: f32[67]. Returns (B, 2) f32."""
    B = x.shape[0]
    block_b = _round_up(block_b, 128)
    tb = min(block_b, _round_up(B, 128))          # lane-aligned batch tile
    b_pad = _round_up(B, tb)

    # Batch-on-lanes: transpose + zero-pad (layout plumbing outside the kernel).
    xt = jnp.pad(x.astype(jnp.float32).T, ((0, 0), (0, b_pad - B)))  # (10, b_pad)

    yt = pl.pallas_call(
        mlp_kernel,
        out_shape=jax.ShapeDtypeStruct((OUT_F, b_pad), jnp.float32),
        grid=(b_pad // tb,),
        in_specs=[
            # Single packed parameter buffer, whole array resident in SMEM.
            pl.BlockSpec(memory_space=pltpu.MemorySpace.SMEM),
            # Activation tiles, batch on the lane axis.
            pl.BlockSpec((IN_F, tb), lambda b: (0, b)),
        ],
        out_specs=pl.BlockSpec((OUT_F, tb), lambda b: (0, b)),
        compiler_params=pltpu.CompilerParams(
            dimension_semantics=("parallel",),   # v7x: split batch tiles across 2 TCs
        ),
    )(packed_params, xt)

    return yt[:, :B].T  # back to (B, 2)


def init_params(key):
    # Deterministic init mimicking nn.Linear's uniform(-1/sqrt(fan_in), +1/sqrt(fan_in)).
    k1, k2, k3, k4 = jax.random.split(key, 4)
    bound1 = 1.0 / jnp.sqrt(10.0)
    bound2 = 1.0 / jnp.sqrt(5.0)
    w1 = jax.random.uniform(k1, (IN_F, HID_F), jnp.float32, -bound1, bound1)
    b1 = jax.random.uniform(k2, (HID_F,), jnp.float32, -bound1, bound1)
    w2 = jax.random.uniform(k3, (HID_F, OUT_F), jnp.float32, -bound2, bound2)
    b2 = jax.random.uniform(k4, (OUT_F,), jnp.float32, -bound2, bound2)
    return w1, b1, w2, b2


if __name__ == "__main__":
    key = jax.random.PRNGKey(0)
    pkey, xkey = jax.random.split(key)
    w1, b1, w2, b2 = init_params(pkey)
    packed = pack_params(w1, b1, w2, b2)   # packed once, reused every call

    batch = 8
    x = jax.random.normal(xkey, (batch, IN_F), jnp.float32)

    out = simple_net_forward(x, packed)
    out = jax.block_until_ready(out)

    # Sanity check against plain-JAX reference (same math as the PyTorch module).
    ref = jnp.maximum(x @ w1 + b1[None, :], 0.0) @ w2 + b2[None, :]
    assert out.shape == (batch, OUT_F)
    assert jnp.allclose(out, ref, atol=1e-5, rtol=1e-5)

    print("KERNEL_OK")
</pallas_src>

<mosaic_0001>
module attributes {stable_mosaic.version = 11 : i64} {
  func.func @mlp_kernel(%arg0: i32, %arg1: memref<67xf32, #tpu.memory_space<smem>>, %arg2: memref<10x128xf32, #tpu.memory_space<vmem>>, %arg3: memref<2x128xf32, #tpu.memory_space<vmem>>) attributes {dimension_semantics = [#tpu.dimension_semantics<parallel>], iteration_bounds = array<i64: 1>, scalar_prefetch = 0 : i64, scratch_operands = 0 : i64, tpu.core_type = #tpu.core_type<tc>, window_params = [{transform_indices = @transform_0, window_bounds = array<i64: 67>}, {transform_indices = @transform_1, window_bounds = array<i64: 10, 128>}, {transform_indices = @transform_2, window_bounds = array<i64: 2, 128>}]} {
    %c0 = arith.constant 0 : index
    %c0_0 = arith.constant 0 : index
    %0 = vector.load %arg2[%c0, %c0_0] : memref<10x128xf32, #tpu.memory_space<vmem>>, vector<1x128xf32>
    %c1 = arith.constant 1 : index
    %c0_1 = arith.constant 0 : index
    %1 = vector.load %arg2[%c1, %c0_1] : memref<10x128xf32, #tpu.memory_space<vmem>>, vector<1x128xf32>
    %c2 = arith.constant 2 : index
    %c0_2 = arith.constant 0 : index
    %2 = vector.load %arg2[%c2, %c0_2] : memref<10x128xf32, #tpu.memory_space<vmem>>, vector<1x128xf32>
    %c3 = arith.constant 3 : index
    %c0_3 = arith.constant 0 : index
    %3 = vector.load %arg2[%c3, %c0_3] : memref<10x128xf32, #tpu.memory_space<vmem>>, vector<1x128xf32>
    %c4 = arith.constant 4 : index
    %c0_4 = arith.constant 0 : index
    %4 = vector.load %arg2[%c4, %c0_4] : memref<10x128xf32, #tpu.memory_space<vmem>>, vector<1x128xf32>
    %c5 = arith.constant 5 : index
    %c0_5 = arith.constant 0 : index
    %5 = vector.load %arg2[%c5, %c0_5] : memref<10x128xf32, #tpu.memory_space<vmem>>, vector<1x128xf32>
    %c6 = arith.constant 6 : index
    %c0_6 = arith.constant 0 : index
    %6 = vector.load %arg2[%c6, %c0_6] : memref<10x128xf32, #tpu.memory_space<vmem>>, vector<1x128xf32>
    %c7 = arith.constant 7 : index
    %c0_7 = arith.constant 0 : index
    %7 = vector.load %arg2[%c7, %c0_7] : memref<10x128xf32, #tpu.memory_space<vmem>>, vector<1x128xf32>
    %c8 = arith.constant 8 : index
    %c0_8 = arith.constant 0 : index
    %8 = vector.load %arg2[%c8, %c0_8] : memref<10x128xf32, #tpu.memory_space<vmem>>, vector<1x128xf32>
    %c9 = arith.constant 9 : index
    %c0_9 = arith.constant 0 : index
    %9 = vector.load %arg2[%c9, %c0_9] : memref<10x128xf32, #tpu.memory_space<vmem>>, vector<1x128xf32>
    %c0_10 = arith.constant 0 : index
    %10 = memref.load %arg1[%c0_10] : memref<67xf32, #tpu.memory_space<smem>>
    %11 = vector.broadcast %10 : f32 to vector<1x128xf32>
    %12 = arith.mulf %0, %11 : vector<1x128xf32>
    %c5_11 = arith.constant 5 : index
    %13 = memref.load %arg1[%c5_11] : memref<67xf32, #tpu.memory_space<smem>>
    %14 = vector.broadcast %13 : f32 to vector<1x128xf32>
    %15 = arith.mulf %1, %14 : vector<1x128xf32>
    %16 = arith.addf %12, %15 : vector<1x128xf32>
    %c10 = arith.constant 10 : index
    %17 = memref.load %arg1[%c10] : memref<67xf32, #tpu.memory_space<smem>>
    %18 = vector.broadcast %17 : f32 to vector<1x128xf32>
    %19 = arith.mulf %2, %18 : vector<1x128xf32>
    %20 = arith.addf %16, %19 : vector<1x128xf32>
    %c15 = arith.constant 15 : index
    %21 = memref.load %arg1[%c15] : memref<67xf32, #tpu.memory_space<smem>>
    %22 = vector.broadcast %21 : f32 to vector<1x128xf32>
    %23 = arith.mulf %3, %22 : vector<1x128xf32>
    %24 = arith.addf %20, %23 : vector<1x128xf32>
    %c20 = arith.constant 20 : index
    %25 = memref.load %arg1[%c20] : memref<67xf32, #tpu.memory_space<smem>>
    %26 = vector.broadcast %25 : f32 to vector<1x128xf32>
    %27 = arith.mulf %4, %26 : vector<1x128xf32>
    %28 = arith.addf %24, %27 : vector<1x128xf32>
    %c25 = arith.constant 25 : index
    %29 = memref.load %arg1[%c25] : memref<67xf32, #tpu.memory_space<smem>>
    %30 = vector.broadcast %29 : f32 to vector<1x128xf32>
    %31 = arith.mulf %5, %30 : vector<1x128xf32>
    %32 = arith.addf %28, %31 : vector<1x128xf32>
    %c30 = arith.constant 30 : index
    %33 = memref.load %arg1[%c30] : memref<67xf32, #tpu.memory_space<smem>>
    %34 = vector.broadcast %33 : f32 to vector<1x128xf32>
    %35 = arith.mulf %6, %34 : vector<1x128xf32>
    %36 = arith.addf %32, %35 : vector<1x128xf32>
    %c35 = arith.constant 35 : index
    %37 = memref.load %arg1[%c35] : memref<67xf32, #tpu.memory_space<smem>>
    %38 = vector.broadcast %37 : f32 to vector<1x128xf32>
    %39 = arith.mulf %7, %38 : vector<1x128xf32>
    %40 = arith.addf %36, %39 : vector<1x128xf32>
    %c40 = arith.constant 40 : index
    %41 = memref.load %arg1[%c40] : memref<67xf32, #tpu.memory_space<smem>>
    %42 = vector.broadcast %41 : f32 to vector<1x128xf32>
    %43 = arith.mulf %8, %42 : vector<1x128xf32>
    %44 = arith.addf %40, %43 : vector<1x128xf32>
    %c45 = arith.constant 45 : index
    %45 = memref.load %arg1[%c45] : memref<67xf32, #tpu.memory_space<smem>>
    %46 = vector.broadcast %45 : f32 to vector<1x128xf32>
    %47 = arith.mulf %9, %46 : vector<1x128xf32>
    %48 = arith.addf %44, %47 : vector<1x128xf32>
    %c50 = arith.constant 50 : index
    %49 = memref.load %arg1[%c50] : memref<67xf32, #tpu.memory_space<smem>>
    %50 = vector.broadcast %49 : f32 to vector<1x128xf32>
    %51 = arith.addf %48, %50 : vector<1x128xf32>
    %cst = arith.constant 0.000000e+00 : f32
    %52 = vector.broadcast %cst : f32 to vector<1x128xf32>
    %53 = arith.maximumf %51, %52 : vector<1x128xf32>
    %c1_12 = arith.constant 1 : index
    %54 = memref.load %arg1[%c1_12] : memref<67xf32, #tpu.memory_space<smem>>
    %55 = vector.broadcast %54 : f32 to vector<1x128xf32>
    %56 = arith.mulf %0, %55 : vector<1x128xf32>
    %c6_13 = arith.constant 6 : index
    %57 = memref.load %arg1[%c6_13] : memref<67xf32, #tpu.memory_space<smem>>
    %58 = vector.broadcast %57 : f32 to vector<1x128xf32>
    %59 = arith.mulf %1, %58 : vector<1x128xf32>
    %60 = arith.addf %56, %59 : vector<1x128xf32>
    %c11 = arith.constant 11 : index
    %61 = memref.load %arg1[%c11] : memref<67xf32, #tpu.memory_space<smem>>
    %62 = vector.broadcast %61 : f32 to vector<1x128xf32>
    %63 = arith.mulf %2, %62 : vector<1x128xf32>
    %64 = arith.addf %60, %63 : vector<1x128xf32>
    %c16 = arith.constant 16 : index
    %65 = memref.load %arg1[%c16] : memref<67xf32, #tpu.memory_space<smem>>
    %66 = vector.broadcast %65 : f32 to vector<1x128xf32>
    %67 = arith.mulf %3, %66 : vector<1x128xf32>
    %68 = arith.addf %64, %67 : vector<1x128xf32>
    %c21 = arith.constant 21 : index
    %69 = memref.load %arg1[%c21] : memref<67xf32, #tpu.memory_space<smem>>
    %70 = vector.broadcast %69 : f32 to vector<1x128xf32>
    %71 = arith.mulf %4, %70 : vector<1x128xf32>
    %72 = arith.addf %68, %71 : vector<1x128xf32>
    %c26 = arith.constant 26 : index
    %73 = memref.load %arg1[%c26] : memref<67xf32, #tpu.memory_space<smem>>
    %74 = vector.broadcast %73 : f32 to vector<1x128xf32>
    %75 = arith.mulf %5, %74 : vector<1x128xf32>
    %76 = arith.addf %72, %75 : vector<1x128xf32>
    %c31 = arith.constant 31 : index
    %77 = memref.load %arg1[%c31] : memref<67xf32, #tpu.memory_space<smem>>
    %78 = vector.broadcast %77 : f32 to vector<1x128xf32>
    %79 = arith.mulf %6, %78 : vector<1x128xf32>
    %80 = arith.addf %76, %79 : vector<1x128xf32>
    %c36 = arith.constant 36 : index
    %81 = memref.load %arg1[%c36] : memref<67xf32, #tpu.memory_space<smem>>
    %82 = vector.broadcast %81 : f32 to vector<1x128xf32>
    %83 = arith.mulf %7, %82 : vector<1x128xf32>
    %84 = arith.addf %80, %83 : vector<1x128xf32>
    %c41 = arith.constant 41 : index
    %85 = memref.load %arg1[%c41] : memref<67xf32, #tpu.memory_space<smem>>
    %86 = vector.broadcast %85 : f32 to vector<1x128xf32>
    %87 = arith.mulf %8, %86 : vector<1x128xf32>
    %88 = arith.addf %84, %87 : vector<1x128xf32>
    %c46 = arith.constant 46 : index
    %89 = memref.load %arg1[%c46] : memref<67xf32, #tpu.memory_space<smem>>
    %90 = vector.broadcast %89 : f32 to vector<1x128xf32>
    %91 = arith.mulf %9, %90 : vector<1x128xf32>
    %92 = arith.addf %88, %91 : vector<1x128xf32>
    %c51 = arith.constant 51 : index
    %93 = memref.load %arg1[%c51] : memref<67xf32, #tpu.memory_space<smem>>
    %94 = vector.broadcast %93 : f32 to vector<1x128xf32>
    %95 = arith.addf %92, %94 : vector<1x128xf32>
    %cst_14 = arith.constant 0.000000e+00 : f32
    %96 = vector.broadcast %cst_14 : f32 to vector<1x128xf32>
    %97 = arith.maximumf %95, %96 : vector<1x128xf32>
    %c2_15 = arith.constant 2 : index
    %98 = memref.load %arg1[%c2_15] : memref<67xf32, #tpu.memory_space<smem>>
    %99 = vector.broadcast %98 : f32 to vector<1x128xf32>
    %100 = arith.mulf %0, %99 : vector<1x128xf32>
    %c7_16 = arith.constant 7 : index
    %101 = memref.load %arg1[%c7_16] : memref<67xf32, #tpu.memory_space<smem>>
    %102 = vector.broadcast %101 : f32 to vector<1x128xf32>
    %103 = arith.mulf %1, %102 : vector<1x128xf32>
    %104 = arith.addf %100, %103 : vector<1x128xf32>
    %c12 = arith.constant 12 : index
    %105 = memref.load %arg1[%c12] : memref<67xf32, #tpu.memory_space<smem>>
    %106 = vector.broadcast %105 : f32 to vector<1x128xf32>
    %107 = arith.mulf %2, %106 : vector<1x128xf32>
    %108 = arith.addf %104, %107 : vector<1x128xf32>
    %c17 = arith.constant 17 : index
    %109 = memref.load %arg1[%c17] : memref<67xf32, #tpu.memory_space<smem>>
    %110 = vector.broadcast %109 : f32 to vector<1x128xf32>
    %111 = arith.mulf %3, %110 : vector<1x128xf32>
    %112 = arith.addf %108, %111 : vector<1x128xf32>
    %c22 = arith.constant 22 : index
    %113 = memref.load %arg1[%c22] : memref<67xf32, #tpu.memory_space<smem>>
    %114 = vector.broadcast %113 : f32 to vector<1x128xf32>
    %115 = arith.mulf %4, %114 : vector<1x128xf32>
    %116 = arith.addf %112, %115 : vector<1x128xf32>
    %c27 = arith.constant 27 : index
    %117 = memref.load %arg1[%c27] : memref<67xf32, #tpu.memory_space<smem>>
    %118 = vector.broadcast %117 : f32 to vector<1x128xf32>
    %119 = arith.mulf %5, %118 : vector<1x128xf32>
    %120 = arith.addf %116, %119 : vector<1x128xf32>
    %c32 = arith.constant 32 : index
    %121 = memref.load %arg1[%c32] : memref<67xf32, #tpu.memory_space<smem>>
    %122 = vector.broadcast %121 : f32 to vector<1x128xf32>
    %123 = arith.mulf %6, %122 : vector<1x128xf32>
    %124 = arith.addf %120, %123 : vector<1x128xf32>
    %c37 = arith.constant 37 : index
    %125 = memref.load %arg1[%c37] : memref<67xf32, #tpu.memory_space<smem>>
    %126 = vector.broadcast %125 : f32 to vector<1x128xf32>
    %127 = arith.mulf %7, %126 : vector<1x128xf32>
    %128 = arith.addf %124, %127 : vector<1x128xf32>
    %c42 = arith.constant 42 : index
    %129 = memref.load %arg1[%c42] : memref<67xf32, #tpu.memory_space<smem>>
    %130 = vector.broadcast %129 : f32 to vector<1x128xf32>
    %131 = arith.mulf %8, %130 : vector<1x128xf32>
    %132 = arith.addf %128, %131 : vector<1x128xf32>
    %c47 = arith.constant 47 : index
    %133 = memref.load %arg1[%c47] : memref<67xf32, #tpu.memory_space<smem>>
    %134 = vector.broadcast %133 : f32 to vector<1x128xf32>
    %135 = arith.mulf %9, %134 : vector<1x128xf32>
    %136 = arith.addf %132, %135 : vector<1x128xf32>
    %c52 = arith.constant 52 : index
    %137 = memref.load %arg1[%c52] : memref<67xf32, #tpu.memory_space<smem>>
    %138 = vector.broadcast %137 : f32 to vector<1x128xf32>
    %139 = arith.addf %136, %138 : vector<1x128xf32>
    %cst_17 = arith.constant 0.000000e+00 : f32
    %140 = vector.broadcast %cst_17 : f32 to vector<1x128xf32>
    %141 = arith.maximumf %139, %140 : vector<1x128xf32>
    %c3_18 = arith.constant 3 : index
    %142 = memref.load %arg1[%c3_18] : memref<67xf32, #tpu.memory_space<smem>>
    %143 = vector.broadcast %142 : f32 to vector<1x128xf32>
    %144 = arith.mulf %0, %143 : vector<1x128xf32>
    %c8_19 = arith.constant 8 : index
    %145 = memref.load %arg1[%c8_19] : memref<67xf32, #tpu.memory_space<smem>>
    %146 = vector.broadcast %145 : f32 to vector<1x128xf32>
    %147 = arith.mulf %1, %146 : vector<1x128xf32>
    %148 = arith.addf %144, %147 : vector<1x128xf32>
    %c13 = arith.constant 13 : index
    %149 = memref.load %arg1[%c13] : memref<67xf32, #tpu.memory_space<smem>>
    %150 = vector.broadcast %149 : f32 to vector<1x128xf32>
    %151 = arith.mulf %2, %150 : vector<1x128xf32>
    %152 = arith.addf %148, %151 : vector<1x128xf32>
    %c18 = arith.constant 18 : index
    %153 = memref.load %arg1[%c18] : memref<67xf32, #tpu.memory_space<smem>>
    %154 = vector.broadcast %153 : f32 to vector<1x128xf32>
    %155 = arith.mulf %3, %154 : vector<1x128xf32>
    %156 = arith.addf %152, %155 : vector<1x128xf32>
    %c23 = arith.constant 23 : index
    %157 = memref.load %arg1[%c23] : memref<67xf32, #tpu.memory_space<smem>>
    %158 = vector.broadcast %157 : f32 to vector<1x128xf32>
    %159 = arith.mulf %4, %158 : vector<1x128xf32>
    %160 = arith.addf %156, %159 : vector<1x128xf32>
    %c28 = arith.constant 28 : index
    %161 = memref.load %arg1[%c28] : memref<67xf32, #tpu.memory_space<smem>>
    %162 = vector.broadcast %161 : f32 to vector<1x128xf32>
    %163 = arith.mulf %5, %162 : vector<1x128xf32>
    %164 = arith.addf %160, %163 : vector<1x128xf32>
    %c33 = arith.constant 33 : index
    %165 = memref.load %arg1[%c33] : memref<67xf32, #tpu.memory_space<smem>>
    %166 = vector.broadcast %165 : f32 to vector<1x128xf32>
    %167 = arith.mulf %6, %166 : vector<1x128xf32>
    %168 = arith.addf %164, %167 : vector<1x128xf32>
    %c38 = arith.constant 38 : index
    %169 = memref.load %arg1[%c38] : memref<67xf32, #tpu.memory_space<smem>>
    %170 = vector.broadcast %169 : f32 to vector<1x128xf32>
    %171 = arith.mulf %7, %170 : vector<1x128xf32>
    %172 = arith.addf %168, %171 : vector<1x128xf32>
    %c43 = arith.constant 43 : index
    %173 = memref.load %arg1[%c43] : memref<67xf32, #tpu.memory_space<smem>>
    %174 = vector.broadcast %173 : f32 to vector<1x128xf32>
    %175 = arith.mulf %8, %174 : vector<1x128xf32>
    %176 = arith.addf %172, %175 : vector<1x128xf32>
    %c48 = arith.constant 48 : index
    %177 = memref.load %arg1[%c48] : memref<67xf32, #tpu.memory_space<smem>>
    %178 = vector.broadcast %177 : f32 to vector<1x128xf32>
    %179 = arith.mulf %9, %178 : vector<1x128xf32>
    %180 = arith.addf %176, %179 : vector<1x128xf32>
    %c53 = arith.constant 53 : index
    %181 = memref.load %arg1[%c53] : memref<67xf32, #tpu.memory_space<smem>>
    %182 = vector.broadcast %181 : f32 to vector<1x128xf32>
    %183 = arith.addf %180, %182 : vector<1x128xf32>
    %cst_20 = arith.constant 0.000000e+00 : f32
    %184 = vector.broadcast %cst_20 : f32 to vector<1x128xf32>
    %185 = arith.maximumf %183, %184 : vector<1x128xf32>
    %c4_21 = arith.constant 4 : index
    %186 = memref.load %arg1[%c4_21] : memref<67xf32, #tpu.memory_space<smem>>
    %187 = vector.broadcast %186 : f32 to vector<1x128xf32>
    %188 = arith.mulf %0, %187 : vector<1x128xf32>
    %c9_22 = arith.constant 9 : index
    %189 = memref.load %arg1[%c9_22] : memref<67xf32, #tpu.memory_space<smem>>
    %190 = vector.broadcast %189 : f32 to vector<1x128xf32>
    %191 = arith.mulf %1, %190 : vector<1x128xf32>
    %192 = arith.addf %188, %191 : vector<1x128xf32>
    %c14 = arith.constant 14 : index
    %193 = memref.load %arg1[%c14] : memref<67xf32, #tpu.memory_space<smem>>
    %194 = vector.broadcast %193 : f32 to vector<1x128xf32>
    %195 = arith.mulf %2, %194 : vector<1x128xf32>
    %196 = arith.addf %192, %195 : vector<1x128xf32>
    %c19 = arith.constant 19 : index
    %197 = memref.load %arg1[%c19] : memref<67xf32, #tpu.memory_space<smem>>
    %198 = vector.broadcast %197 : f32 to vector<1x128xf32>
    %199 = arith.mulf %3, %198 : vector<1x128xf32>
    %200 = arith.addf %196, %199 : vector<1x128xf32>
    %c24 = arith.constant 24 : index
    %201 = memref.load %arg1[%c24] : memref<67xf32, #tpu.memory_space<smem>>
    %202 = vector.broadcast %201 : f32 to vector<1x128xf32>
    %203 = arith.mulf %4, %202 : vector<1x128xf32>
    %204 = arith.addf %200, %203 : vector<1x128xf32>
    %c29 = arith.constant 29 : index
    %205 = memref.load %arg1[%c29] : memref<67xf32, #tpu.memory_space<smem>>
    %206 = vector.broadcast %205 : f32 to vector<1x128xf32>
    %207 = arith.mulf %5, %206 : vector<1x128xf32>
    %208 = arith.addf %204, %207 : vector<1x128xf32>
    %c34 = arith.constant 34 : index
    %209 = memref.load %arg1[%c34] : memref<67xf32, #tpu.memory_space<smem>>
    %210 = vector.broadcast %209 : f32 to vector<1x128xf32>
    %211 = arith.mulf %6, %210 : vector<1x128xf32>
    %212 = arith.addf %208, %211 : vector<1x128xf32>
    %c39 = arith.constant 39 : index
    %213 = memref.load %arg1[%c39] : memref<67xf32, #tpu.memory_space<smem>>
    %214 = vector.broadcast %213 : f32 to vector<1x128xf32>
    %215 = arith.mulf %7, %214 : vector<1x128xf32>
    %216 = arith.addf %212, %215 : vector<1x128xf32>
    %c44 = arith.constant 44 : index
    %217 = memref.load %arg1[%c44] : memref<67xf32, #tpu.memory_space<smem>>
    %218 = vector.broadcast %217 : f32 to vector<1x128xf32>
    %219 = arith.mulf %8, %218 : vector<1x128xf32>
    %220 = arith.addf %216, %219 : vector<1x128xf32>
    %c49 = arith.constant 49 : index
    %221 = memref.load %arg1[%c49] : memref<67xf32, #tpu.memory_space<smem>>
    %222 = vector.broadcast %221 : f32 to vector<1x128xf32>
    %223 = arith.mulf %9, %222 : vector<1x128xf32>
    %224 = arith.addf %220, %223 : vector<1x128xf32>
    %c54 = arith.constant 54 : index
    %225 = memref.load %arg1[%c54] : memref<67xf32, #tpu.memory_space<smem>>
    %226 = vector.broadcast %225 : f32 to vector<1x128xf32>
    %227 = arith.addf %224, %226 : vector<1x128xf32>
    %cst_23 = arith.constant 0.000000e+00 : f32
    %228 = vector.broadcast %cst_23 : f32 to vector<1x128xf32>
    %229 = arith.maximumf %227, %228 : vector<1x128xf32>
    %c55 = arith.constant 55 : index
    %230 = memref.load %arg1[%c55] : memref<67xf32, #tpu.memory_space<smem>>
    %231 = vector.broadcast %230 : f32 to vector<1x128xf32>
    %232 = arith.mulf %53, %231 : vector<1x128xf32>
    %c57 = arith.constant 57 : index
    %233 = memref.load %arg1[%c57] : memref<67xf32, #tpu.memory_space<smem>>
    %234 = vector.broadcast %233 : f32 to vector<1x128xf32>
    %235 = arith.mulf %97, %234 : vector<1x128xf32>
    %236 = arith.addf %232, %235 : vector<1x128xf32>
    %c59 = arith.constant 59 : index
    %237 = memref.load %arg1[%c59] : memref<67xf32, #tpu.memory_space<smem>>
    %238 = vector.broadcast %237 : f32 to vector<1x128xf32>
    %239 = arith.mulf %141, %238 : vector<1x128xf32>
    %240 = arith.addf %236, %239 : vector<1x128xf32>
    %c61 = arith.constant 61 : index
    %241 = memref.load %arg1[%c61] : memref<67xf32, #tpu.memory_space<smem>>
    %242 = vector.broadcast %241 : f32 to vector<1x128xf32>
    %243 = arith.mulf %185, %242 : vector<1x128xf32>
    %244 = arith.addf %240, %243 : vector<1x128xf32>
    %c63 = arith.constant 63 : index
    %245 = memref.load %arg1[%c63] : memref<67xf32, #tpu.memory_space<smem>>
    %246 = vector.broadcast %245 : f32 to vector<1x128xf32>
    %247 = arith.mulf %229, %246 : vector<1x128xf32>
    %248 = arith.addf %244, %247 : vector<1x128xf32>
    %c65 = arith.constant 65 : index
    %249 = memref.load %arg1[%c65] : memref<67xf32, #tpu.memory_space<smem>>
    %250 = vector.broadcast %249 : f32 to vector<1x128xf32>
    %251 = arith.addf %248, %250 : vector<1x128xf32>
    %c0_24 = arith.constant 0 : index
    %c0_25 = arith.constant 0 : index
    %252 = vector.load %arg3[%c0_24, %c0_25] : memref<2x128xf32, #tpu.memory_space<vmem>>, vector<1x128xf32>
    tpu.vector_store %arg3[%c0_24, %c0_25], %251 {strides = array<i32>} : memref<2x128xf32, #tpu.memory_space<vmem>>, vector<1x128xf32>,
    %c56 = arith.constant 56 : index
    %253 = memref.load %arg1[%c56] : memref<67xf32, #tpu.memory_space<smem>>
    %254 = vector.broadcast %253 : f32 to vector<1x128xf32>
    %255 = arith.mulf %53, %254 : vector<1x128xf32>
    %c58 = arith.constant 58 : index
    %256 = memref.load %arg1[%c58] : memref<67xf32, #tpu.memory_space<smem>>
    %257 = vector.broadcast %256 : f32 to vector<1x128xf32>
    %258 = arith.mulf %97, %257 : vector<1x128xf32>
    %259 = arith.addf %255, %258 : vector<1x128xf32>
    %c60 = arith.constant 60 : index
    %260 = memref.load %arg1[%c60] : memref<67xf32, #tpu.memory_space<smem>>
    %261 = vector.broadcast %260 : f32 to vector<1x128xf32>
    %262 = arith.mulf %141, %261 : vector<1x128xf32>
    %263 = arith.addf %259, %262 : vector<1x128xf32>
    %c62 = arith.constant 62 : index
    %264 = memref.load %arg1[%c62] : memref<67xf32, #tpu.memory_space<smem>>
    %265 = vector.broadcast %264 : f32 to vector<1x128xf32>
    %266 = arith.mulf %185, %265 : vector<1x128xf32>
    %267 = arith.addf %263, %266 : vector<1x128xf32>
    %c64 = arith.constant 64 : index
    %268 = memref.load %arg1[%c64] : memref<67xf32, #tpu.memory_space<smem>>
    %269 = vector.broadcast %268 : f32 to vector<1x128xf32>
    %270 = arith.mulf %229, %269 : vector<1x128xf32>
    %271 = arith.addf %267, %270 : vector<1x128xf32>
    %c66 = arith.constant 66 : index
    %272 = memref.load %arg1[%c66] : memref<67xf32, #tpu.memory_space<smem>>
    %273 = vector.broadcast %272 : f32 to vector<1x128xf32>
    %274 = arith.addf %271, %273 : vector<1x128xf32>
    %c1_26 = arith.constant 1 : index
    %c0_27 = arith.constant 0 : index
    %275 = vector.load %arg3[%c1_26, %c0_27] : memref<2x128xf32, #tpu.memory_space<vmem>>, vector<1x128xf32>
    tpu.vector_store %arg3[%c1_26, %c0_27], %274 {strides = array<i32>} : memref<2x128xf32, #tpu.memory_space<vmem>>, vector<1x128xf32>,
    return
  }
  func.func @transform_0(%arg0: i32) -> i32 {
    %c0_i32 = arith.constant 0 : i32
    %c0_i32_0 = arith.constant 0 : i32
    return %c0_i32 : i32
  }
  func.func @transform_1(%arg0: i32) -> (i32, i32) {
    %c0_i32 = arith.constant 0 : i32
    %c0_i32_0 = arith.constant 0 : i32
    return %c0_i32, %arg0 : i32, i32
  }
  func.func @transform_2(%arg0: i32) -> (i32, i32) {
    %c0_i32 = arith.constant 0 : i32
    %c0_i32_0 = arith.constant 0 : i32
    return %c0_i32, %arg0 : i32, i32
  }
}

</mosaic_0001>

<bundles_post_ra>
// kernel: simple_net_forward.1
= control target key start
LH: loop header
LB: loop body
LE: loop exit
PB: predicated region body
PF: predicated region fallthrough
CT: control target
= control target key end

     0   :  { %7 = vsyncpa [#allocation3], 0  ;;  %s626_s0 = inlined_call_operand.vmem [shape: f32[67], index: 0, kind: input, shape index: {}]   ;;  %s627_s1 = inlined_call_operand.vmem [shape: f32[10,128], index: 1, kind: input, shape index: {}]   ;;  %s628_s2 = inlined_call_operand.vmem [shape: f32[2,128], index: 2, kind: output, shape index: {}]  }
   0x1   :  { %s14_s11 = sshll.u32 %s626_s0, 4  ;;  %s15_s11 = int_to_ptr.vmem [resolvable:$true] %s14_s11 }
   0x2   :  { %s367_s12 = scalar_lea.vmem %s15_s11, 16  ;;  %p372_p1 = scmp.lt.s32.totalorder %s15_s11, %s15_s11 }
   0x3   :  { %p368_p0 = scmp.ne.s32.totalorder %s15_s11, %s367_s12  ;;  %p373_p2 = scmp.lt.s32.totalorder %s367_s12, %s367_s12 }
   0x5   :  { %p374_p3 = por %p373_p2, %p372_p1 }
   0x7   :  { %p375_p4 = pnand %p374_p3, %p368_p0 }
   0x9   :  { %378 = shalt.err (!%p375_p4)
}
   0xa   :  { %s381_s13 = smov [#allocation2]  }
   0xb   :  { %17 = dma.vmem_to_smem %s15_s11, 16, %s381_s13, [#allocation3]  }
   0xc   :  { %379 = dma.done.wait [#allocation3], 16  }
   0xd   :  { %380 = vsyncadd [#allocation3], 4294967280 }
   0xe   :  { %23 = sfence }
   0xf   :  { %s34_s14 = sld [smem:[#allocation2]]  ;;  %v403_v0 = vld [vmem:[%s627_s1] sm:$0x1]  ;;  %v410_v1 = vld [vmem:[%s627_s1 + $0x1] sm:$0x1] }
  0x10   :  { %s300_s15 = sld [smem:[#allocation2 + $0x5]]  ;;  %v422_v5 = vld [vmem:[%s627_s1 + $0x2] sm:$0x1]  ;;  %v435_v10 = vld [vmem:[%s627_s1 + $0x3] sm:$0x1] }
  0x11   :  { %s301_s16 = sld [smem:[#allocation2 + $0xa]]  ;;  %v443_v14 = vld [vmem:[%s627_s1 + $0x4] sm:$0x1]  ;;  %v460_v23 = vld [vmem:[%s627_s1 + $0x5] sm:$0x1] }
  0x12   :  { %s302_s17 = sld [smem:[#allocation2 + $0xf]]  ;;  %v474_v33 = vld [vmem:[%s627_s1 + $0x6] sm:$0x1]  ;;  %v487_v40 = vld [vmem:[%s627_s1 + $0x7] sm:$0x1] }
  0x13   :  { %s405_s0 = sld [smem:[#allocation2 + $0x14]]  ;;  %v507_v54 = vld [vmem:[%s627_s1 + $0x8] sm:$0x1] }
  0x14   :  { %s412_s22 = sld [smem:[#allocation2 + $0x19]] }
  0x15   :  { %v35_v2 = vstv %s34_s14  ;;  %s414_s23 = sld [smem:[#allocation2 + $0x1e]] }
  0x16   :  { %v36_v3 = vmul.f32 %v35_v2, %v403_v0  ;;  %v38_v4 = vstv %s300_s15  ;;  %s417_s24 = sld [smem:[#allocation2 + $0x23]] }
  0x17   :  { %v39_v6 = vmul.f32 %v38_v4, %v410_v1  ;;  %v42_v7 = vstv %s301_s16  ;;  %s425_s27 = sld [smem:[#allocation2 + $0x28]] }
  0x18   :  { %s427_s28 = sld [smem:[#allocation2 + $0x2d]]  ;;  %v43_v9 = vmul.f32 %v42_v7, %v422_v5  ;;  %v46_v11 = vstv %s302_s17  ;;  %v523_v7 = vld [vmem:[%s627_s1 + $0x9] sm:$0x1] }
  0x19   :  { %s429_s29 = sld [smem:[#allocation2 + $0x32]]  ;;  %v40_v8 = vadd.f32 %v39_v6, %v36_v3  ;;  %v47_v13 = vmul.f32 %v46_v11, %v435_v10  ;;  %v50_v15 = vstv %s405_s0 }
  0x1a   :  { %s310_s30 = sld [smem:[#allocation2 + $0x1]]  ;;  %v51_v20 = vmul.f32 %v50_v15, %v443_v14  ;;  %v54_v24 = vstv %s412_s22 }
  0x1b   :  { %s311_s5 = sld [smem:[#allocation2 + $0x6]]  ;;  %v44_v12 = vadd.f32 %v43_v9, %v40_v8  ;;  %v55_v30 = vmul.f32 %v54_v24, %v460_v23  ;;  %v58_v34 = vstv %s414_s23 }
  0x1c   :  { %s312_s6 = sld [smem:[#allocation2 + $0xb]]  ;;  %v59_v39 = vmul.f32 %v58_v34, %v474_v33  ;;  %v62_v41 = vstv %s417_s24 }
  0x1d   :  { %s313_s7 = sld [smem:[#allocation2 + $0x10]]  ;;  %v48_v19 = vadd.f32 %v47_v13, %v44_v12  ;;  %v63_v51 = vmul.f32 %v62_v41, %v487_v40  ;;  %v66_v55 = vstv %s425_s27 }
  0x1e   :  { %s438_s8 = sld [smem:[#allocation2 + $0x15]]  ;;  %v67_v4 = vmul.f32 %v66_v55, %v507_v54  ;;  %v70_v8 = vstv %s427_s28 }
  0x1f   :  { %s446_s11 = sld [smem:[#allocation2 + $0x1a]]  ;;  %v52_v29 = vadd.f32 %v51_v20, %v48_v19  ;;  %v71_v20 = vmul.f32 %v70_v8, %v523_v7 }
  0x20   :  { %v78_v16 = vstv %s310_s30  ;;  %s448_s12 = sld [smem:[#allocation2 + $0x1f]] }
  0x21   :  { %v79_v17 = vmul.f32 %v78_v16, %v403_v0  ;;  %v81_v18 = vstv %s311_s5  ;;  %s451_s13 = sld [smem:[#allocation2 + $0x24]]  ;;  %v56_v38 = vadd.f32 %v55_v30, %v52_v29 }
  0x22   :  { %v82_v21 = vmul.f32 %v81_v18, %v410_v1  ;;  %v85_v22 = vstv %s312_s6  ;;  %s455_s14 = sld [smem:[#allocation2 + $0x29]] }
  0x23   :  { %v86_v25 = vmul.f32 %v85_v22, %v422_v5  ;;  %v89_v26 = vstv %s313_s7  ;;  %s464_s17 = sld [smem:[#allocation2 + $0x2e]]  ;;  %v60_v50 = vadd.f32 %v59_v39, %v56_v38 }
  0x24   :  { %v83_v27 = vadd.f32 %v82_v21, %v79_v17  ;;  %s466_s18 = sld [smem:[#allocation2 + $0x33]]  ;;  %v90_v28 = vmul.f32 %v89_v26, %v435_v10  ;;  %v93_v32 = vstv %s438_s8 }
  0x25   :  { %s321_s19 = sld [smem:[#allocation2 + $0x2]]  ;;  %v94_v36 = vmul.f32 %v93_v32, %v443_v14  ;;  %v97_v37 = vstv %s446_s11  ;;  %v64_v3 = vadd.f32 %v63_v51, %v60_v50 }
  0x26   :  { %v87_v31 = vadd.f32 %v86_v25, %v83_v27  ;;  %s322_s0 = sld [smem:[#allocation2 + $0x7]]  ;;  %v98_v43 = vmul.f32 %v97_v37, %v460_v23  ;;  %v101_v47 = vstv %s448_s12 }
  0x27   :  { %s323_s22 = sld [smem:[#allocation2 + $0xc]]  ;;  %v102_v59 = vmul.f32 %v101_v47, %v474_v33  ;;  %v105_v62 = vstv %s451_s13  ;;  %v68_v19 = vadd.f32 %v67_v4, %v64_v3 }
  0x28   :  { %s324_s25 = sld [smem:[#allocation2 + $0x11]]  ;;  %v91_v35 = vadd.f32 %v90_v28, %v87_v31  ;;  %v106_v12 = vmul.f32 %v105_v62, %v487_v40  ;;  %v109_v16 = vstv %s455_s14 }
  0x29   :  { %s479_s26 = sld [smem:[#allocation2 + $0x16]]  ;;  %v110_v27 = vmul.f32 %v109_v16, %v507_v54 }
  0x2a   :  { %s482_s30 = sld [smem:[#allocation2 + $0x1b]]  ;;  %v95_v46 = vadd.f32 %v94_v36, %v91_v35  ;;  %v113_v36 = vstv %s464_s17 }
  0x2b   :  { %v121_v42 = vstv %s321_s19  ;;  %s490_s23 = sld [smem:[#allocation2 + $0x20]]  ;;  %v114_v50 = vmul.f32 %v113_v36, %v523_v7 }
  0x2c   :  { %v122_v44 = vmul.f32 %v121_v42, %v403_v0  ;;  %v124_v45 = vstv %s322_s0  ;;  %s494_s5 = sld [smem:[#allocation2 + $0x25]]  ;;  %v99_v61 = vadd.f32 %v98_v43, %v95_v46 }
  0x2d   :  { %v125_v48 = vmul.f32 %v124_v45, %v410_v1  ;;  %v128_v49 = vstv %s323_s22  ;;  %s498_s6 = sld [smem:[#allocation2 + $0x2a]] }
  0x2e   :  { %v129_v52 = vmul.f32 %v128_v49, %v422_v5  ;;  %v132_v53 = vstv %s324_s25  ;;  %s502_s24 = sld [smem:[#allocation2 + $0x2f]]  ;;  %v103_v15 = vadd.f32 %v102_v59, %v99_v61  ;;  %v117_v59 = vstv %s466_s18 }
  0x2f   :  { %v126_v56 = vadd.f32 %v125_v48, %v122_v44  ;;  %v133_v57 = vmul.f32 %v132_v53, %v435_v10  ;;  %v136_v58 = vstv %s479_s26  ;;  %s512_s9 = sld [smem:[#allocation2 + $0x34]]  ;;  %v72_v44 = vadd.f32 %v71_v20, %v68_v19 }
  0x30   :  { %v140_v60 = vstv %s482_s30  ;;  %s332_s10 = sld [smem:[#allocation2 + $0x3]]  ;;  %v137_v2 = vmul.f32 %v136_v58, %v443_v14  ;;  %v107_v31 = vadd.f32 %v106_v12, %v103_v15  ;;  %v74_v48 = vstv %s429_s29 }
  0x31   :  { %v130_v63 = vadd.f32 %v129_v52, %v126_v56  ;;  %s333_s11 = sld [smem:[#allocation2 + $0x8]]  ;;  %v144_v6 = vstv %s490_s23  ;;  %v141_v11 = vmul.f32 %v140_v60, %v460_v23  ;;  %v569_v58 = vadd.f32 %v74_v48, %v72_v44 }
  0x32   :  { %s334_s27 = sld [smem:[#allocation2 + $0xd]]  ;;  %v148_v13 = vstv %s494_s5  ;;  %v145_v18 = vmul.f32 %v144_v6, %v474_v33  ;;  %v111_v49 = vadd.f32 %v110_v27, %v107_v31 }
  0x33   :  { %v134_v9 = vadd.f32 %v133_v57, %v130_v63  ;;  %s335_s13 = sld [smem:[#allocation2 + $0x12]]  ;;  %v149_v24 = vmul.f32 %v148_v13, %v487_v40  ;;  %v152_v28 = vstv %s498_s6 }
  0x34   :  { %s529_s16 = sld [smem:[#allocation2 + $0x17]]  ;;  %v153_v42 = vmul.f32 %v152_v28, %v507_v54  ;;  %v156_v45 = vstv %s502_s24  ;;  %v115_v62 = vadd.f32 %v114_v50, %v111_v49  ;;  %v76_v28 = vmax.f32 %v569_v58, 0.0 }
  0x35   :  { %v138_v17 = vadd.f32 %v137_v2, %v134_v9  ;;  %s533_s19 = sld [smem:[#allocation2 + $0x1c]]  ;;  %v157_v56 = vmul.f32 %v156_v45, %v523_v7  ;;  %v160_v63 = vstv %s512_s9 }
  0x36   :  { %v164_v21 = vstv %s332_s10  ;;  %s536_s1 = sld [smem:[#allocation2 + $0x21]] }
  0x37   :  { %v142_v22 = vadd.f32 %v141_v11, %v138_v17  ;;  %v165_v25 = vmul.f32 %v164_v21, %v403_v0  ;;  %v167_v26 = vstv %s333_s11  ;;  %s540_s28 = sld [smem:[#allocation2 + $0x26]] }
  0x38   :  { %v168_v29 = vmul.f32 %v167_v26, %v410_v1  ;;  %v171_v30 = vstv %s334_s27  ;;  %s545_s14 = sld [smem:[#allocation2 + $0x2b]] }
  0x39   :  { %v146_v32 = vadd.f32 %v145_v18, %v142_v22  ;;  %v172_v34 = vmul.f32 %v171_v30, %v422_v5  ;;  %v175_v35 = vstv %s335_s13  ;;  %s548_s0 = sld [smem:[#allocation2 + $0x30]]  ;;  %v118_v22 = vadd.f32 %v117_v59, %v115_v62 }
  0x3a   :  { %v169_v37 = vadd.f32 %v168_v29, %v165_v25  ;;  %v176_v38 = vmul.f32 %v175_v35, %v435_v10  ;;  %v179_v39 = vstv %s529_s16  ;;  %s553_s20 = sld [smem:[#allocation2 + $0x35]] }
  0x3b   :  { %v150_v41 = vadd.f32 %v149_v24, %v146_v32  ;;  %v183_v43 = vstv %s533_s19  ;;  %s343_s21 = sld [smem:[#allocation2 + $0x4]]  ;;  %v180_v47 = vmul.f32 %v179_v39, %v443_v14  ;;  %v119_v35 = vmax.f32 %v118_v22, 0.0 }
  0x3c   :  { %v173_v46 = vadd.f32 %v172_v34, %v169_v37  ;;  %s559_s17 = sld [smem:[#allocation2 + $0x9]]  ;;  %v187_v51 = vstv %s536_s1  ;;  %v184_v53 = vmul.f32 %v183_v43, %v460_v23 }
  0x3d   :  { %s345_s22 = sld [smem:[#allocation2 + $0xe]]  ;;  %v154_v55 = vadd.f32 %v153_v42, %v150_v41  ;;  %v191_v57 = vstv %s540_s28  ;;  %v188_v61 = vmul.f32 %v187_v51, %v474_v33 }
  0x3e   :  { %v177_v52 = vadd.f32 %v176_v38, %v173_v46  ;;  %s346_s25 = sld [smem:[#allocation2 + $0x13]]  ;;  %v195_v2 = vstv %s545_s14  ;;  %v192_v6 = vmul.f32 %v191_v57, %v487_v40 }
  0x3f   :  { %s567_s26 = sld [smem:[#allocation2 + $0x18]]  ;;  %v158_v11 = vadd.f32 %v157_v56, %v154_v55  ;;  %v199_v12 = vstv %s548_s0  ;;  %v196_v17 = vmul.f32 %v195_v2, %v507_v54 }
  0x40   :  { %v181_v60 = vadd.f32 %v180_v47, %v177_v52  ;;  %s573_s29 = sld [smem:[#allocation2 + $0x1d]]  ;;  %v200_v24 = vmul.f32 %v199_v12, %v523_v7  ;;  %v203_v30 = vstv %s553_s20 }
  0x41   :  { %v207_v3 = vstv %s343_s21  ;;  %s577_s30 = sld [smem:[#allocation2 + $0x22]]  ;;  %v161_v26 = vadd.f32 %v160_v63, %v158_v11 }
  0x42   :  { %v185_v4 = vadd.f32 %v184_v53, %v181_v60  ;;  %v208_v8 = vmul.f32 %v207_v3, %v403_v0  ;;  %v210_v9 = vstv %s559_s17  ;;  %s582_s3 = sld [smem:[#allocation2 + $0x27]] }
  0x43   :  { %v211_v13 = vmul.f32 %v210_v9, %v410_v1  ;;  %v214_v15 = vstv %s345_s22  ;;  %s588_s18 = sld [smem:[#allocation2 + $0x2c]] }
  0x44   :  { %v189_v16 = vadd.f32 %v188_v61, %v185_v4  ;;  %v215_v18 = vmul.f32 %v214_v15, %v422_v5  ;;  %v218_v19 = vstv %s346_s25  ;;  %s592_s4 = sld [smem:[#allocation2 + $0x31]] }
  0x45   :  { %v212_v20 = vadd.f32 %v211_v13, %v208_v8  ;;  %v219_v0 = vmul.f32 %v218_v19, %v435_v10  ;;  %v222_v21 = vstv %s567_s26  ;;  %s354_s23 = sld [smem:[#allocation2 + $0x37]] }
  0x46   :  { %v193_v1 = vadd.f32 %v192_v6, %v189_v16  ;;  %v226_v25 = vstv %s573_s29  ;;  %v223_v27 = vmul.f32 %v222_v21, %v443_v14  ;;  %s355_s5 = sld [smem:[#allocation2 + $0x39]]  ;;  %v162_v14 = vmax.f32 %v161_v26, 0.0 }
  0x47   :  { %v216_v5 = vadd.f32 %v215_v18, %v212_v20  ;;  %v230_v10 = vstv %s577_s30  ;;  %s599_s6 = sld [smem:[#allocation2 + $0x3b]]  ;;  %v227_v32 = vmul.f32 %v226_v25, %v460_v23 }
  0x48   :  { %v197_v29 = vadd.f32 %v196_v17, %v193_v1  ;;  %v234_v34 = vstv %s582_s3  ;;  %s604_s24 = sld [smem:[#allocation2 + $0x3d]]  ;;  %v231_v38 = vmul.f32 %v230_v10, %v474_v33 }
  0x49   :  { %v220_v31 = vadd.f32 %v219_v0, %v216_v5  ;;  %s606_s7 = sld [smem:[#allocation2 + $0x36]]  ;;  %v235_v41 = vmul.f32 %v234_v34, %v487_v40  ;;  %v238_v42 = vstv %s588_s18 }
  0x4a   :  { %v201_v36 = vadd.f32 %v200_v24, %v197_v29  ;;  %s609_s8 = sld [smem:[#allocation2 + $0x3f]]  ;;  %v242_v44 = vstv %s592_s4  ;;  %v239_v33 = vmul.f32 %v238_v42, %v507_v54 }
  0x4b   :  { %v224_v37 = vadd.f32 %v223_v27, %v220_v31  ;;  %v250_v23 = vstv %s354_s23  ;;  %s360_s9 = sld [smem:[#allocation2 + $0x38]]  ;;  %v243_v40 = vmul.f32 %v242_v44, %v523_v7 }
  0x4c   :  { %v204_v39 = vadd.f32 %v203_v30, %v201_v36  ;;  %v251_v45 = vmul.f32 %v250_v23, %v76_v28  ;;  %v253_v46 = vstv %s355_s5  ;;  %s361_s10 = sld [smem:[#allocation2 + $0x3a]] }
  0x4d   :  { %v228_v43 = vadd.f32 %v227_v32, %v224_v37  ;;  %v254_v47 = vmul.f32 %v253_v46, %v119_v35  ;;  %v257_v48 = vstv %s599_s6  ;;  %s362_s11 = sld [smem:[#allocation2 + $0x3c]] }
  0x4e   :  { %s363_s27 = sld [smem:[#allocation2 + $0x3e]]  ;;  %v205_v50 = vmax.f32 %v204_v39, 0.0  ;;  %v258_v53 = vmul.f32 %v257_v48, %v162_v14  ;;  %v261_v55 = vstv %s604_s24 }
  0x4f   :  { %v232_v49 = vadd.f32 %v231_v38, %v228_v43  ;;  %s364_s12 = sld [smem:[#allocation2 + $0x40]]  ;;  %v255_v52 = vadd.f32 %v254_v47, %v251_v45  ;;  %v246_v60 = vstv %s606_s7 }
  0x50   :  { %s359_s15 = sld [smem:[#allocation2 + $0x41]]  ;;  %v262_v61 = vmul.f32 %v261_v55, %v205_v50  ;;  %v265_v9 = vstv %s609_s8 }
  0x51   :  { %v236_v51 = vadd.f32 %v235_v41, %v232_v49  ;;  %v273_v56 = vstv %s360_s9  ;;  %s365_s13 = sld [smem:[#allocation2 + $0x42]]  ;;  %v259_v2 = vadd.f32 %v258_v53, %v255_v52 }
  0x52   :  { %v274_v58 = vmul.f32 %v273_v56, %v76_v28  ;;  %v276_v59 = vstv %s361_s10 }
  0x53   :  { %v240_v57 = vadd.f32 %v239_v33, %v236_v51  ;;  %v277_v62 = vmul.f32 %v276_v59, %v119_v35  ;;  %v280_v63 = vstv %s362_s11  ;;  %v263_v15 = vadd.f32 %v262_v61, %v259_v2 }
  0x54   :  { %v281_v3 = vmul.f32 %v280_v63, %v162_v14  ;;  %v284_v7 = vstv %s363_s27 }
  0x55   :  { %v244_v54 = vadd.f32 %v243_v40, %v240_v57  ;;  %v278_v4 = vadd.f32 %v277_v62, %v274_v58  ;;  %v285_v6 = vmul.f32 %v284_v7, %v205_v50  ;;  %v288_v12 = vstv %s364_s12 }
  0x56   :  { %v269_v19 = vstv %s359_s15 }
  0x57   :  { %v247_v8 = vadd.f32 %v246_v60, %v244_v54  ;;  %v282_v11 = vadd.f32 %v281_v3, %v278_v4  ;;  %v292_v20 = vstv %s365_s13 }
  0x59   :  { %v248_v13 = vmax.f32 %v247_v8, 0.0  ;;  %v286_v16 = vadd.f32 %v285_v6, %v282_v11 }
  0x5b   :  { %v266_v17 = vmul.f32 %v265_v9, %v248_v13  ;;  %v289_v18 = vmul.f32 %v288_v12, %v248_v13 }
  0x5d   :  { %v267_v0 = vadd.f32 %v266_v17, %v263_v15  ;;  %v290_v21 = vadd.f32 %v289_v18, %v286_v16 }
  0x5f   :  { %v270_v22 = vadd.f32 %v269_v19, %v267_v0  ;;  %v293_v1 = vadd.f32 %v292_v20, %v290_v21 }
  0x61   :  { %271 = vst [vmem:[%s628_s2] sm:$0x1] %v270_v22  ;;  %294 = vst [vmem:[%s628_s2 + $0x1] sm:$0x1] %v293_v1 }
  0x62   :  { %299 = vsyncpa [#allocation3], 1 }

</bundles_post_ra>
